<compile_context>
chip_gen: v7x
topology: tpu7x:2x2x1
jax: 0.10.0
libtpu: 0.0.40
codegen_flags: <defaults>
</compile_context>

<pallas_src>
import numpy as np
import jax
import jax.numpy as jnp
from jax import lax
from jax.experimental import pallas as pl
from jax.experimental.pallas import tpu as pltpu

# ----------------------------- config ---------------------------------------
B = 2        # batch
S = 16       # seq_len
C_IN = 4     # input feature channels (Conv1d `input` ctor arg)
OUT = 6      # output classes (`output` ctor arg)
K1, C1 = 6, 32
K2, C2 = 4, 64
K3, C3 = 2, 96
FC1 = 1024
L1 = S - K1 + 1          # 11
L2 = L1 - K2 + 1         # 8
L3 = L2 - K3 + 1         # 7  (valid conv3 rows per example)

# Static sanity checks (review correctness concern: don't silently pool garbage)
assert L3 >= 1, "seq_len too short for the conv stack (need S >= K1+K2+K3-2)"
assert OUT + 1 <= 8, "fc2 pack reserves row OUT for the fc1 bias"

# Packed conv-weight layout (im2col (K*C_in, C_out) blocks, 8-aligned row offsets)
def _align8(n):
    return (n + 7) // 8 * 8

W1_ROWS = K1 * C_IN      # 24
W2_ROWS = K2 * C1        # 128
W3_ROWS = K3 * C2        # 128
O1 = 0
O2 = O1 + _align8(W1_ROWS)
O3 = O2 + _align8(W2_ROWS)
PACK_ROWS = _align8(O3 + W3_ROWS)
PACK_LANES = 128
assert O2 % 8 == 0 and O3 % 8 == 0 and PACK_ROWS % 8 == 0
assert max(C1, C2, C3, OUT) <= PACK_LANES


# ------------------------------ kernel ---------------------------------------
def _im2col_roll(h, k):
    """(R, C) -> (R, k*C); row t = [h[t], h[t+1], ..., h[t+k-1]]  (indices mod R).

    Rows whose window straddles an example boundary are garbage and are masked
    out before the max-pool.  pltpu.roll keeps every sublane offset aligned
    (no odd-offset row slices feeding the MXU)."""
    r = h.shape[0]
    cols = [h] + [pltpu.roll(h, shift=r - tap, axis=0) for tap in range(1, k)]
    return jnp.concatenate(cols, axis=1)


def tpn_fused_kernel(x_ref, convw_ref, bias_ref, fc2_ref, wf1_hbm_ref,
                     o_ref, wf1_vmem, wf1_sem):
    # (1) Start the big fc1-weight DMA immediately; it overlaps the conv stack.
    wf1_copy = pltpu.make_async_copy(wf1_hbm_ref, wf1_vmem, wf1_sem)
    wf1_copy.start()

    # x: (B*S, K1*C_IN) -- conv1 windows already laid out along lanes (wrapper).
    h = x_ref[...]

    # conv1 / conv2 / conv3: one im2col matmul per layer, fused bias + ReLU.
    h = jnp.maximum(
        jnp.dot(h, convw_ref[O1:O1 + W1_ROWS, :C1],
                preferred_element_type=jnp.float32) + bias_ref[0:1, :C1], 0.0)
    h = jnp.maximum(
        jnp.dot(_im2col_roll(h, K2), convw_ref[O2:O2 + W2_ROWS, :C2],
                preferred_element_type=jnp.float32) + bias_ref[1:2, :C2], 0.0)
    h = jnp.maximum(
        jnp.dot(_im2col_roll(h, K3), convw_ref[O3:O3 + W3_ROWS, :C3],
                preferred_element_type=jnp.float32) + bias_ref[2:3, :C3], 0.0)
    # dropout(p=0.1) is identity with training=False
    # TODO(synk): training=True dropout path not implemented in-kernel.

    # Masked max-pool over time.  Rows with (row % S) >= L3 are conv windows
    # that straddled an example boundary; mask them to 0 (safe: h >= 0 after
    # ReLU and every example has >= 1 valid row), then reduce per example.
    row_id = lax.broadcasted_iota(jnp.int32, (B * S, C3), 0)
    h = jnp.where((row_id % S) < L3, h, 0.0)
    pooled = jnp.max(h.reshape(B, S, C3), axis=1)            # (B, C3)

    # fc1 weights only needed now -> wait for the overlapped DMA.
    wf1_copy.wait()

    # fc1: bf16 weights (halved DMA, native MXU dtype), f32 accumulation.
    f = jnp.dot(pooled.astype(jnp.bfloat16), wf1_vmem[...],
                preferred_element_type=jnp.float32) + fc2_ref[OUT:OUT + 1, :]
    f = jnp.maximum(f, 0.0)                                   # (B, FC1)

    # fc2: weights stored as (OUT, FC1); contract the 1024 axis (lane-dense).
    logits = lax.dot_general(
        f, fc2_ref[0:OUT, :],
        dimension_numbers=(((1,), (1,)), ((), ())),
        preferred_element_type=jnp.float32) + bias_ref[3:4, :OUT]
    # (B, OUT) store: single masked vst, negligible at this size (review item 9).
    o_ref[...] = jnp.maximum(logits, 0.0)


# --------------------------- wrapper ------------------------------------------
@jax.jit
def tpn_forward(x, params):
    """Fused forward. x: (B, S, C_IN) -> (B, OUT). training=False path."""
    x2d = x.reshape(B * S, C_IN)
    # conv1 im2col: pure input-layout plumbing (3 KiB), done once in the wrapper.
    idx = (jnp.arange(B * S)[:, None] + jnp.arange(K1)[None, :]) % (B * S)
    x_im2col = x2d[idx].reshape(B * S, K1 * C_IN)             # (B*S, 24)

    flops = (2 * B * S * W1_ROWS * C1 + 2 * B * S * W2_ROWS * C2
             + 2 * B * S * W3_ROWS * C3 + 2 * B * C3 * FC1 + 2 * B * FC1 * OUT)
    bytes_accessed = (B * S * K1 * C_IN * 4 + PACK_ROWS * PACK_LANES * 4
                      + 8 * PACK_LANES * 4 + 8 * FC1 * 4 + C3 * FC1 * 2
                      + B * OUT * 4)

    vmem_spec = pl.BlockSpec(memory_space=pltpu.MemorySpace.VMEM)
    return pl.pallas_call(
        tpn_fused_kernel,
        out_shape=jax.ShapeDtypeStruct((B, OUT), jnp.float32),
        in_specs=[vmem_spec, vmem_spec, vmem_spec, vmem_spec,
                  pl.BlockSpec(memory_space=pl.ANY)],   # wf1 stays in HBM
        out_specs=vmem_spec,
        scratch_shapes=[pltpu.VMEM((C3, FC1), jnp.bfloat16),   # wf1 landing buffer
                        pltpu.SemaphoreType.DMA],
        cost_estimate=pl.CostEstimate(flops=flops, transcendentals=0,
                                      bytes_accessed=bytes_accessed),
        # no grid: single invocation, everything (<0.6 MiB) resident in VMEM
    )(x_im2col, params["conv_pack"], params["bias_pack"], params["fc2_pack"],
      params["wf1_bf16"])


# ----------------------------- params ------------------------------------------
def init_params(key):
    ks = jax.random.split(key, 10)

    def nrm(k, shape, fan_in):
        return (jax.random.normal(k, shape) / np.sqrt(fan_in)).astype(jnp.float32)

    # PyTorch-layout conv weights: (C_out, C_in, K); biases (C_out,)
    w1 = nrm(ks[0], (C1, C_IN, K1), C_IN * K1)
    w2 = nrm(ks[1], (C2, C1, K2), C1 * K2)
    w3 = nrm(ks[2], (C3, C2, K3), C2 * K3)
    b1 = 0.1 * nrm(ks[3], (C1,), 1.0)
    b2 = 0.1 * nrm(ks[4], (C2,), 1.0)
    b3 = 0.1 * nrm(ks[5], (C3,), 1.0)
    # FC weights stored as (in, out)
    wf1 = nrm(ks[6], (C3, FC1), C3)
    wf2 = nrm(ks[7], (FC1, OUT), FC1)
    bf1 = 0.1 * nrm(ks[8], (FC1,), 1.0)
    bf2 = 0.1 * nrm(ks[9], (OUT,), 1.0)

    def im2col_w(w, k, cin, cout):
        # (C_out, C_in, K) -> (K*C_in, C_out), row index = tap*C_in + c
        return jnp.transpose(w, (2, 1, 0)).reshape(k * cin, cout)

    # Packed conv weights: one (PACK_ROWS, 128) f32 slab, 8-aligned row offsets.
    conv_pack = jnp.zeros((PACK_ROWS, PACK_LANES), jnp.float32)
    conv_pack = conv_pack.at[O1:O1 + W1_ROWS, :C1].set(im2col_w(w1, K1, C_IN, C1))
    conv_pack = conv_pack.at[O2:O2 + W2_ROWS, :C2].set(im2col_w(w2, K2, C1, C2))
    conv_pack = conv_pack.at[O3:O3 + W3_ROWS, :C3].set(im2col_w(w3, K3, C2, C3))

    # Packed small biases: rows 0..3 = b1, b2, b3, bf2 (lane-padded).
    bias_pack = jnp.zeros((8, PACK_LANES), jnp.float32)
    bias_pack = bias_pack.at[0, :C1].set(b1)
    bias_pack = bias_pack.at[1, :C2].set(b2)
    bias_pack = bias_pack.at[2, :C3].set(b3)
    bias_pack = bias_pack.at[3, :OUT].set(bf2)

    # fc2 pack: rows 0..OUT-1 = wf2^T (OUT, FC1), row OUT = bf1.
    fc2_pack = jnp.zeros((8, FC1), jnp.float32)
    fc2_pack = fc2_pack.at[0:OUT, :].set(wf2.T)
    fc2_pack = fc2_pack.at[OUT, :].set(bf1)

    return {
        # raw (reference) layouts
        "w1": w1, "b1": b1, "w2": w2, "b2": b2, "w3": w3, "b3": b3,
        "wf1": wf1, "bf1": bf1, "wf2": wf2, "bf2": bf2,
        # kernel layouts
        "conv_pack": conv_pack, "bias_pack": bias_pack, "fc2_pack": fc2_pack,
        "wf1_bf16": wf1.astype(jnp.bfloat16),
    }


# --------------------------- pure-JAX reference ---------------------------------
def reference_forward(x, p):
    h = jnp.transpose(x, (0, 2, 1))                  # (B, C_IN, S)
    for w, b in ((p["w1"], p["b1"]), (p["w2"], p["b2"]), (p["w3"], p["b3"])):
        h = lax.conv_general_dilated(
            h, w, window_strides=(1,), padding="VALID",
            dimension_numbers=("NCH", "OIH", "NCH"))
        h = jax.nn.relu(h + b[None, :, None])
    h = jnp.max(h, axis=2)                           # (B, 96)
    h = jax.nn.relu(h @ p["wf1"] + p["bf1"])
    h = jax.nn.relu(h @ p["wf2"] + p["bf2"])
    return h


# -------------------------------- main ------------------------------------------
if __name__ == "__main__":
    key = jax.random.PRNGKey(0)
    kx, kp = jax.random.split(key)
    x = jax.random.normal(kx, (B, S, C_IN), dtype=jnp.float32)
    params = init_params(kp)

    out = tpn_forward(x, params)
    out = jax.block_until_ready(out)
    assert out.shape == (B, OUT)

    ref = reference_forward(x, params)
    err = float(jnp.max(jnp.abs(out - ref)))
    assert jnp.allclose(out, ref, rtol=1e-2, atol=1e-2), f"max abs err {err}"

    print("KERNEL_OK")
</pallas_src>

<mosaic_0001>
module attributes {stable_mosaic.version = 11 : i64} {
  func.func @tpn_fused_kernel(%arg0: memref<32x24xf32, #tpu.memory_space<vmem>>, %arg1: memref<280x128xf32, #tpu.memory_space<vmem>>, %arg2: memref<8x128xf32, #tpu.memory_space<vmem>>, %arg3: memref<8x1024xf32, #tpu.memory_space<vmem>>, %arg4: memref<96x1024xbf16, #tpu.memory_space<any>>, %arg5: memref<2x6xf32, #tpu.memory_space<vmem>>, %arg6: memref<96x1024xbf16, #tpu.memory_space<vmem>>, %arg7: memref<!tpu.dma_semaphore, #tpu.memory_space<semaphore_mem>>) attributes {dimension_semantics = [], scalar_prefetch = 0 : i64, scratch_operands = 2 : i64, tpu.core_type = #tpu.core_type<tc>} {
    tpu.enqueue_dma source(%arg4 : memref<96x1024xbf16, #tpu.memory_space<any>>) target(%arg6 : memref<96x1024xbf16, #tpu.memory_space<vmem>>) target_semaphore(%arg7 : memref<!tpu.dma_semaphore, #tpu.memory_space<semaphore_mem>>)
    %c0 = arith.constant 0 : index
    %c0_0 = arith.constant 0 : index
    %0 = vector.load %arg0[%c0, %c0_0] : memref<32x24xf32, #tpu.memory_space<vmem>>, vector<32x24xf32>
    %c0_1 = arith.constant 0 : index
    %c0_2 = arith.constant 0 : index
    %1 = vector.load %arg1[%c0_1, %c0_2] : memref<280x128xf32, #tpu.memory_space<vmem>>, vector<24x32xf32>
    %cst = arith.constant dense<0.000000e+00> : vector<32x32xf32>
    %2 = tpu.matmul %0, %1, %cst {dimension_numbers = #tpu.dot_dimension_numbers<[1], [0], [0], [1], [0, 0, 1, 1], [], []>} : vector<32x24xf32>, vector<24x32xf32>, vector<32x32xf32> -> vector<32x32xf32>
    %c0_3 = arith.constant 0 : index
    %c0_4 = arith.constant 0 : index
    %3 = vector.load %arg2[%c0_3, %c0_4] : memref<8x128xf32, #tpu.memory_space<vmem>>, vector<1x32xf32>
    %4 = vector.broadcast %3 : vector<1x32xf32> to vector<32x32xf32>
    %5 = arith.addf %2, %4 : vector<32x32xf32>
    %cst_5 = arith.constant 0.000000e+00 : f32
    %6 = vector.broadcast %cst_5 : f32 to vector<32x32xf32>
    %7 = arith.maximumf %5, %6 : vector<32x32xf32>
    %c31_i32 = arith.constant 31 : i32
    %8 = tpu.dynamic_rotate %7 by %c31_i32 dim 0 : vector<32x32xf32>, i32 -> vector<32x32xf32>
    %c30_i32 = arith.constant 30 : i32
    %9 = tpu.dynamic_rotate %7 by %c30_i32 dim 0 : vector<32x32xf32>, i32 -> vector<32x32xf32>
    %c29_i32 = arith.constant 29 : i32
    %10 = tpu.dynamic_rotate %7 by %c29_i32 dim 0 : vector<32x32xf32>, i32 -> vector<32x32xf32>
    %11 = tpu.concatenate %7, %8, %9, %10 in 1 : vector<32x32xf32>, vector<32x32xf32>, vector<32x32xf32>, vector<32x32xf32> -> vector<32x128xf32>
    %c24 = arith.constant 24 : index
    %c0_6 = arith.constant 0 : index
    %12 = vector.load %arg1[%c24, %c0_6] : memref<280x128xf32, #tpu.memory_space<vmem>>, vector<128x64xf32>
    %cst_7 = arith.constant dense<0.000000e+00> : vector<32x64xf32>
    %13 = tpu.matmul %11, %12, %cst_7 {dimension_numbers = #tpu.dot_dimension_numbers<[1], [0], [0], [1], [0, 0, 1, 1], [], []>} : vector<32x128xf32>, vector<128x64xf32>, vector<32x64xf32> -> vector<32x64xf32>
    %c1 = arith.constant 1 : index
    %c0_8 = arith.constant 0 : index
    %14 = vector.load %arg2[%c1, %c0_8] : memref<8x128xf32, #tpu.memory_space<vmem>>, vector<1x64xf32>
    %15 = vector.broadcast %14 : vector<1x64xf32> to vector<32x64xf32>
    %16 = arith.addf %13, %15 : vector<32x64xf32>
    %cst_9 = arith.constant 0.000000e+00 : f32
    %17 = vector.broadcast %cst_9 : f32 to vector<32x64xf32>
    %18 = arith.maximumf %16, %17 : vector<32x64xf32>
    %c31_i32_10 = arith.constant 31 : i32
    %19 = tpu.dynamic_rotate %18 by %c31_i32_10 dim 0 : vector<32x64xf32>, i32 -> vector<32x64xf32>
    %20 = tpu.concatenate %18, %19 in 1 : vector<32x64xf32>, vector<32x64xf32> -> vector<32x128xf32>
    %c152 = arith.constant 152 : index
    %c0_11 = arith.constant 0 : index
    %21 = vector.load %arg1[%c152, %c0_11] : memref<280x128xf32, #tpu.memory_space<vmem>>, vector<128x96xf32>
    %cst_12 = arith.constant dense<0.000000e+00> : vector<32x96xf32>
    %22 = tpu.matmul %20, %21, %cst_12 {dimension_numbers = #tpu.dot_dimension_numbers<[1], [0], [0], [1], [0, 0, 1, 1], [], []>} : vector<32x128xf32>, vector<128x96xf32>, vector<32x96xf32> -> vector<32x96xf32>
    %c2 = arith.constant 2 : index
    %c0_13 = arith.constant 0 : index
    %23 = vector.load %arg2[%c2, %c0_13] : memref<8x128xf32, #tpu.memory_space<vmem>>, vector<1x96xf32>
    %24 = vector.broadcast %23 : vector<1x96xf32> to vector<32x96xf32>
    %25 = arith.addf %22, %24 : vector<32x96xf32>
    %cst_14 = arith.constant 0.000000e+00 : f32
    %26 = vector.broadcast %cst_14 : f32 to vector<32x96xf32>
    %27 = arith.maximumf %25, %26 : vector<32x96xf32>
    %28 = tpu.iota {dimensions = array<i32: 0>} : vector<32x96xi32>
    %c16_i32 = arith.constant 16 : i32
    %c0_i32 = arith.constant 0 : i32
    %29 = arith.cmpi eq, %c16_i32, %c0_i32 : i32
    %c1_i32 = arith.constant 1 : i32
    %30 = arith.select %29, %c1_i32, %c16_i32 : i32
    %31 = vector.broadcast %30 : i32 to vector<32x96xi32>
    %32 = arith.remsi %28, %31 : vector<32x96xi32>
    %c0_i32_15 = arith.constant 0 : i32
    %33 = vector.broadcast %c0_i32_15 : i32 to vector<32x96xi32>
    %34 = arith.cmpi ne, %32, %33 : vector<32x96xi32>
    %c0_i32_16 = arith.constant 0 : i32
    %35 = vector.broadcast %c0_i32_16 : i32 to vector<32x96xi32>
    %36 = arith.cmpi slt, %32, %35 : vector<32x96xi32>
    %c0_i32_17 = arith.constant 0 : i32
    %37 = arith.cmpi slt, %30, %c0_i32_17 : i32
    %38 = vector.broadcast %37 : i1 to vector<32x96xi1>
    %39 = vector.broadcast %38 : vector<32x96xi1> to vector<32x96xi1>
    %40 = arith.xori %36, %39 : vector<32x96xi1>
    %41 = arith.andi %40, %34 : vector<32x96xi1>
    %42 = vector.broadcast %30 : i32 to vector<32x96xi32>
    %43 = arith.addi %32, %42 : vector<32x96xi32>
    %44 = arith.select %41, %43, %32 : vector<32x96xi1>, vector<32x96xi32>
    %c7_i32 = arith.constant 7 : i32
    %45 = vector.broadcast %c7_i32 : i32 to vector<32x96xi32>
    %46 = arith.cmpi slt, %44, %45 : vector<32x96xi32>
    %cst_18 = arith.constant 0.000000e+00 : f32
    %47 = vector.broadcast %cst_18 : f32 to vector<32x96xf32>
    %48 = arith.select %46, %27, %47 : vector<32x96xi1>, vector<32x96xf32>
    %49 = vector.shape_cast %48 : vector<32x96xf32> to vector<2x16x96xf32>
    %cst_19 = arith.constant dense<0xFF800000> : vector<2x96xf32>
    %50 = vector.multi_reduction <maximumf>, %49, %cst_19 [1] : vector<2x16x96xf32> to vector<2x96xf32>
    tpu.wait_dma2 semaphore(%arg7 : memref<!tpu.dma_semaphore, #tpu.memory_space<semaphore_mem>>) src(%arg4 : memref<96x1024xbf16, #tpu.memory_space<any>>) dst(%arg6 : memref<96x1024xbf16, #tpu.memory_space<vmem>>)
    %51 = arith.truncf %50 : vector<2x96xf32> to vector<2x96xbf16>
    %c0_20 = arith.constant 0 : index
    %c0_21 = arith.constant 0 : index
    %52 = vector.load %arg6[%c0_20, %c0_21] : memref<96x1024xbf16, #tpu.memory_space<vmem>>, vector<96x1024xbf16>
    %cst_22 = arith.constant dense<0.000000e+00> : vector<2x1024xf32>
    %53 = tpu.matmul %51, %52, %cst_22 {dimension_numbers = #tpu.dot_dimension_numbers<[1], [0], [0], [1], [0, 0, 1, 1], [], []>} : vector<2x96xbf16>, vector<96x1024xbf16>, vector<2x1024xf32> -> vector<2x1024xf32>
    %c6 = arith.constant 6 : index
    %c0_23 = arith.constant 0 : index
    %54 = vector.load %arg3[%c6, %c0_23] : memref<8x1024xf32, #tpu.memory_space<vmem>>, vector<1x1024xf32>
    %55 = vector.broadcast %54 : vector<1x1024xf32> to vector<2x1024xf32>
    %56 = arith.addf %53, %55 : vector<2x1024xf32>
    %cst_24 = arith.constant 0.000000e+00 : f32
    %57 = vector.broadcast %cst_24 : f32 to vector<2x1024xf32>
    %58 = arith.maximumf %56, %57 : vector<2x1024xf32>
    %c0_25 = arith.constant 0 : index
    %c0_26 = arith.constant 0 : index
    %59 = vector.load %arg3[%c0_25, %c0_26] : memref<8x1024xf32, #tpu.memory_space<vmem>>, vector<6x1024xf32>
    %cst_27 = arith.constant dense<0.000000e+00> : vector<2x6xf32>
    %60 = tpu.matmul %58, %59, %cst_27 {dimension_numbers = #tpu.dot_dimension_numbers<[1], [1], [0], [0], [0, 0, 1, 0], [], []>} : vector<2x1024xf32>, vector<6x1024xf32>, vector<2x6xf32> -> vector<2x6xf32>
    %c3 = arith.constant 3 : index
    %c0_28 = arith.constant 0 : index
    %61 = vector.load %arg2[%c3, %c0_28] : memref<8x128xf32, #tpu.memory_space<vmem>>, vector<1x6xf32>
    %62 = vector.broadcast %61 : vector<1x6xf32> to vector<2x6xf32>
    %63 = arith.addf %60, %62 : vector<2x6xf32>
    %cst_29 = arith.constant 0.000000e+00 : f32
    %64 = vector.broadcast %cst_29 : f32 to vector<2x6xf32>
    %65 = arith.maximumf %63, %64 : vector<2x6xf32>
    %c0_30 = arith.constant 0 : index
    %c0_31 = arith.constant 0 : index
    %66 = vector.load %arg5[%c0_30, %c0_31] : memref<2x6xf32, #tpu.memory_space<vmem>>, vector<2x6xf32>
    tpu.vector_store %arg5[%c0_30, %c0_31], %65 {strides = array<i32>} : memref<2x6xf32, #tpu.memory_space<vmem>>, vector<2x6xf32>,
    return
  }
}

</mosaic_0001>

<bundles_post_ra>
// kernel: tpn_forward.1
= control target key start
LH: loop header
LB: loop body
LE: loop exit
PB: predicated region body
PF: predicated region fallthrough
CT: control target
= control target key end

     0   :  { %10 = vsyncpa [#allocation5], 0  ;;  %s2464_s0 = inlined_call_operand.vmem [shape: f32[32,24], index: 0, kind: input, shape index: {}]   ;;  %s2465_s1 = inlined_call_operand.vmem [shape: f32[280,128], index: 1, kind: input, shape index: {}]   ;;  %s2466_s2 = inlined_call_operand.vmem [shape: f32[8,128], index: 2, kind: input, shape index: {}]   ;;  %s2467_s3 = inlined_call_operand.vmem [shape: f32[8,1024], index: 3, kind: input, shape index: {}]   ;;  %s2468_s4 = inlined_call_operand.vmem [shape: bf16[96,1024], index: 4, kind: input, shape index: {}]   ;;  %s2469_s5 = inlined_call_operand.hbm [shape: f32[2,6], index: 5, kind: output, shape index: {}]  }
   0x1   :  { %v37_v0 = vld [vmem:[%s2468_s4] sm:$0xf]  ;;  %v41_v2 = vld [vmem:[%s2468_s4 + $0x4] sm:$0xf]  ;;  %v45_v4 = vld [vmem:[%s2468_s4 + $0x8] sm:$0xf] }
   0x2   :  { %v39_v1 = vld [vmem:[%s2468_s4 + $0x20] sm:$0xf]  ;;  %38 = vst [vmem:[#allocation2] sm:$0xf] %v37_v0  ;;  %v43_v3 = vld [vmem:[%s2468_s4 + $0x24] sm:$0xf] }
   0x3   :  { %40 = vst [vmem:[#allocation2 + $0x4] sm:$0xf] %v39_v1  ;;  %42 = vst [vmem:[#allocation2 + $0x8] sm:$0xf] %v41_v2  ;;  %v47_v5 = vld [vmem:[%s2468_s4 + $0x28] sm:$0xf] }
   0x4   :  { %44 = vst [vmem:[#allocation2 + $0xc] sm:$0xf] %v43_v3  ;;  %46 = vst [vmem:[#allocation2 + $0x10] sm:$0xf] %v45_v4  ;;  %v49_v6 = vld [vmem:[%s2468_s4 + $0xc] sm:$0xf] }
   0x5   :  { %v51_v7 = vld [vmem:[%s2468_s4 + $0x2c] sm:$0xf]  ;;  %48 = vst [vmem:[#allocation2 + $0x14] sm:$0xf] %v47_v5  ;;  %50 = vst [vmem:[#allocation2 + $0x18] sm:$0xf] %v49_v6 }
   0x6   :  { %52 = vst [vmem:[#allocation2 + $0x1c] sm:$0xf] %v51_v7  ;;  %v53_v8 = vld [vmem:[%s2468_s4 + $0x10] sm:$0xf]  ;;  %v57_v10 = vld [vmem:[%s2468_s4 + $0x14] sm:$0xf] }
   0x7   :  { %v55_v9 = vld [vmem:[%s2468_s4 + $0x30] sm:$0xf]  ;;  %54 = vst [vmem:[#allocation2 + $0x20] sm:$0xf] %v53_v8  ;;  %58 = vst [vmem:[#allocation2 + $0x28] sm:$0xf] %v57_v10 }
   0x8   :  { %56 = vst [vmem:[#allocation2 + $0x24] sm:$0xf] %v55_v9  ;;  %v59_v11 = vld [vmem:[%s2468_s4 + $0x34] sm:$0xf]  ;;  %v61_v12 = vld [vmem:[%s2468_s4 + $0x18] sm:$0xf] }
   0x9   :  { %v63_v13 = vld [vmem:[%s2468_s4 + $0x38] sm:$0xf]  ;;  %60 = vst [vmem:[#allocation2 + $0x2c] sm:$0xf] %v59_v11  ;;  %62 = vst [vmem:[#allocation2 + $0x30] sm:$0xf] %v61_v12 }
   0xa   :  { %64 = vst [vmem:[#allocation2 + $0x34] sm:$0xf] %v63_v13  ;;  %v65_v14 = vld [vmem:[%s2468_s4 + $0x1c] sm:$0xf]  ;;  %v71_v16 = vld [vmem:[%s2468_s4 + $0x60] sm:$0xf] }
   0xb   :  { %v67_v15 = vld [vmem:[%s2468_s4 + $0x3c] sm:$0xff]   ;;  %66 = vst [vmem:[#allocation2 + $0x38] sm:$0xf] %v65_v14  ;;  %72 = vst [vmem:[#allocation2 + $0x44] sm:$0xf] %v71_v16 }
   0xc   :  { %68 = vst [vmem:[#allocation2 + $0x3c] sm:$0xff] %v67_v15   ;;  %v73_v17 = vld [vmem:[%s2468_s4 + $0x44] sm:$0xf]  ;;  %v77_v19 = vld [vmem:[%s2468_s4 + $0x48] sm:$0xf]  ;;  %v99_v30 = vld [vmem:[%s2468_s4 + $0x7c] sm:$0xff]  }
   0xd   :  { %v75_v18 = vld [vmem:[%s2468_s4 + $0x64] sm:$0xf]  ;;  %74 = vst [vmem:[#allocation2 + $0x48] sm:$0xf] %v73_v17  ;;  %78 = vst [vmem:[#allocation2 + $0x50] sm:$0xf] %v77_v19 }
   0xe   :  { %76 = vst [vmem:[#allocation2 + $0x4c] sm:$0xf] %v75_v18  ;;  %v79_v20 = vld [vmem:[%s2468_s4 + $0x68] sm:$0xf]  ;;  %v81_v21 = vld [vmem:[%s2468_s4 + $0x4c] sm:$0xf] }
   0xf   :  { %v83_v22 = vld [vmem:[%s2468_s4 + $0x6c] sm:$0xf]  ;;  %80 = vst [vmem:[#allocation2 + $0x54] sm:$0xf] %v79_v20  ;;  %82 = vst [vmem:[#allocation2 + $0x58] sm:$0xf] %v81_v21 }
  0x10   :  { %84 = vst [vmem:[#allocation2 + $0x5c] sm:$0xf] %v83_v22  ;;  %v85_v23 = vld [vmem:[%s2468_s4 + $0x50] sm:$0xf]  ;;  %v89_v25 = vld [vmem:[%s2468_s4 + $0x54] sm:$0xf] }
  0x11   :  { %v87_v24 = vld [vmem:[%s2468_s4 + $0x70] sm:$0xf]  ;;  %86 = vst [vmem:[#allocation2 + $0x60] sm:$0xf] %v85_v23  ;;  %90 = vst [vmem:[#allocation2 + $0x68] sm:$0xf] %v89_v25 }
  0x12   :  { %88 = vst [vmem:[#allocation2 + $0x64] sm:$0xf] %v87_v24  ;;  %v91_v26 = vld [vmem:[%s2468_s4 + $0x74] sm:$0xf]  ;;  %v93_v27 = vld [vmem:[%s2468_s4 + $0x58] sm:$0xf] }
  0x13   :  { %v95_v28 = vld [vmem:[%s2468_s4 + $0x78] sm:$0xf]  ;;  %92 = vst [vmem:[#allocation2 + $0x6c] sm:$0xf] %v91_v26  ;;  %94 = vst [vmem:[#allocation2 + $0x70] sm:$0xf] %v93_v27 }
  0x14   :  { %96 = vst [vmem:[#allocation2 + $0x74] sm:$0xf] %v95_v28  ;;  %v97_v29 = vld [vmem:[%s2468_s4 + $0x5c] sm:$0xf]  ;;  %v103_v31 = vld [vmem:[%s2468_s4 + $0xa0] sm:$0xf] }
  0x15   :  { %98 = vst [vmem:[#allocation2 + $0x78] sm:$0xf] %v97_v29  ;;  %100 = vst [vmem:[#allocation2 + $0x7c] sm:$0xff] %v99_v30   ;;  %v105_v32 = vld [vmem:[%s2468_s4 + $0x84] sm:$0xf]  ;;  %v131_v45 = vld [vmem:[%s2468_s4 + $0xbc] sm:$0xff]  }
  0x16   :  { %104 = vst [vmem:[#allocation2 + $0x84] sm:$0xf] %v103_v31  ;;  %v107_v33 = vld [vmem:[%s2468_s4 + $0xa4] sm:$0xf]  ;;  %v109_v34 = vld [vmem:[%s2468_s4 + $0x88] sm:$0xf] }
  0x17   :  { %106 = vst [vmem:[#allocation2 + $0x88] sm:$0xf] %v105_v32  ;;  %108 = vst [vmem:[#allocation2 + $0x8c] sm:$0xf] %v107_v33  ;;  %v111_v35 = vld [vmem:[%s2468_s4 + $0xa8] sm:$0xf] }
  0x18   :  { %110 = vst [vmem:[#allocation2 + $0x90] sm:$0xf] %v109_v34  ;;  %v113_v36 = vld [vmem:[%s2468_s4 + $0x8c] sm:$0xf]  ;;  %112 = vst [vmem:[#allocation2 + $0x94] sm:$0xf] %v111_v35 }
  0x19   :  { %v115_v37 = vld [vmem:[%s2468_s4 + $0xac] sm:$0xf]  ;;  %114 = vst [vmem:[#allocation2 + $0x98] sm:$0xf] %v113_v36  ;;  %v117_v38 = vld [vmem:[%s2468_s4 + $0x90] sm:$0xf] }
  0x1a   :  { %116 = vst [vmem:[#allocation2 + $0x9c] sm:$0xf] %v115_v37  ;;  %v119_v39 = vld [vmem:[%s2468_s4 + $0xb0] sm:$0xf]  ;;  %v121_v40 = vld [vmem:[%s2468_s4 + $0x94] sm:$0xf] }
  0x1b   :  { %118 = vst [vmem:[#allocation2 + $0xa0] sm:$0xf] %v117_v38  ;;  %120 = vst [vmem:[#allocation2 + $0xa4] sm:$0xf] %v119_v39  ;;  %v123_v41 = vld [vmem:[%s2468_s4 + $0xb4] sm:$0xf] }
  0x1c   :  { %122 = vst [vmem:[#allocation2 + $0xa8] sm:$0xf] %v121_v40  ;;  %v125_v42 = vld [vmem:[%s2468_s4 + $0x98] sm:$0xf]  ;;  %124 = vst [vmem:[#allocation2 + $0xac] sm:$0xf] %v123_v41 }
  0x1d   :  { %v127_v43 = vld [vmem:[%s2468_s4 + $0xb8] sm:$0xf]  ;;  %126 = vst [vmem:[#allocation2 + $0xb0] sm:$0xf] %v125_v42  ;;  %v129_v44 = vld [vmem:[%s2468_s4 + $0x9c] sm:$0xf] }
  0x1e   :  { %128 = vst [vmem:[#allocation2 + $0xb4] sm:$0xf] %v127_v43  ;;  %v135_v46 = vld [vmem:[%s2468_s4 + $0xe0] sm:$0xf]  ;;  %130 = vst [vmem:[#allocation2 + $0xb8] sm:$0xf] %v129_v44 }
  0x1f   :  { %132 = vst [vmem:[#allocation2 + $0xbc] sm:$0xff] %v131_v45   ;;  %136 = vst [vmem:[#allocation2 + $0xc4] sm:$0xf] %v135_v46  ;;  %v137_v47 = vld [vmem:[%s2468_s4 + $0xc4] sm:$0xf]  ;;  %v163_v60 = vld [vmem:[%s2468_s4 + $0xfc] sm:$0xff]  }
  0x20   :  { %v139_v48 = vld [vmem:[%s2468_s4 + $0xe4] sm:$0xf]  ;;  %v141_v49 = vld [vmem:[%s2468_s4 + $0xc8] sm:$0xf]  ;;  %138 = vst [vmem:[#allocation2 + $0xc8] sm:$0xf] %v137_v47 }
  0x21   :  { %140 = vst [vmem:[#allocation2 + $0xcc] sm:$0xf] %v139_v48  ;;  %142 = vst [vmem:[#allocation2 + $0xd0] sm:$0xf] %v141_v49  ;;  %v143_v50 = vld [vmem:[%s2468_s4 + $0xe8] sm:$0xf] }
  0x22   :  { %v145_v51 = vld [vmem:[%s2468_s4 + $0xcc] sm:$0xf]  ;;  %144 = vst [vmem:[#allocation2 + $0xd4] sm:$0xf] %v143_v50  ;;  %v149_v53 = vld [vmem:[%s2468_s4 + $0xd0] sm:$0xf] }
  0x23   :  { %v147_v52 = vld [vmem:[%s2468_s4 + $0xec] sm:$0xf]  ;;  %146 = vst [vmem:[#allocation2 + $0xd8] sm:$0xf] %v145_v51  ;;  %v151_v54 = vld [vmem:[%s2468_s4 + $0xf0] sm:$0xf] }
  0x24   :  { %148 = vst [vmem:[#allocation2 + $0xdc] sm:$0xf] %v147_v52  ;;  %v153_v55 = vld [vmem:[%s2468_s4 + $0xd4] sm:$0xf]  ;;  %150 = vst [vmem:[#allocation2 + $0xe0] sm:$0xf] %v149_v53 }
  0x25   :  { %152 = vst [vmem:[#allocation2 + $0xe4] sm:$0xf] %v151_v54  ;;  %154 = vst [vmem:[#allocation2 + $0xe8] sm:$0xf] %v153_v55  ;;  %v155_v56 = vld [vmem:[%s2468_s4 + $0xf4] sm:$0xf] }
  0x26   :  { %v157_v57 = vld [vmem:[%s2468_s4 + $0xd8] sm:$0xf]  ;;  %156 = vst [vmem:[#allocation2 + $0xec] sm:$0xf] %v155_v56  ;;  %v161_v59 = vld [vmem:[%s2468_s4 + $0xdc] sm:$0xf] }
  0x27   :  { %v159_v58 = vld [vmem:[%s2468_s4 + $0xf8] sm:$0xf]  ;;  %158 = vst [vmem:[#allocation2 + $0xf0] sm:$0xf] %v157_v57  ;;  %v167_v61 = vld [vmem:[%s2468_s4 + $0x120] sm:$0xf] }
  0x28   :  { %160 = vst [vmem:[#allocation2 + $0xf4] sm:$0xf] %v159_v58  ;;  %162 = vst [vmem:[#allocation2 + $0xf8] sm:$0xf] %v161_v59  ;;  %v169_v62 = vld [vmem:[%s2468_s4 + $0x104] sm:$0xf] }
  0x29   :  { %164 = vst [vmem:[#allocation2 + $0xfc] sm:$0xff] %v163_v60   ;;  %168 = vst [vmem:[#allocation2 + $0x104] sm:$0xf] %v167_v61  ;;  %v171_v63 = vld [vmem:[%s2468_s4 + $0x124] sm:$0xf]  ;;  %v195_v11 = vld [vmem:[%s2468_s4 + $0x13c] sm:$0xff]  }
  0x2a   :  { %v173_v0 = vld [vmem:[%s2468_s4 + $0x108] sm:$0xf]  ;;  %170 = vst [vmem:[#allocation2 + $0x108] sm:$0xf] %v169_v62  ;;  %172 = vst [vmem:[#allocation2 + $0x10c] sm:$0xf] %v171_v63 }
  0x2b   :  { %174 = vst [vmem:[#allocation2 + $0x110] sm:$0xf] %v173_v0  ;;  %v175_v1 = vld [vmem:[%s2468_s4 + $0x128] sm:$0xf]  ;;  %v177_v2 = vld [vmem:[%s2468_s4 + $0x10c] sm:$0xf] }
  0x2c   :  { %v179_v3 = vld [vmem:[%s2468_s4 + $0x12c] sm:$0xf]  ;;  %176 = vst [vmem:[#allocation2 + $0x114] sm:$0xf] %v175_v1  ;;  %178 = vst [vmem:[#allocation2 + $0x118] sm:$0xf] %v177_v2 }
  0x2d   :  { %180 = vst [vmem:[#allocation2 + $0x11c] sm:$0xf] %v179_v3  ;;  %v181_v4 = vld [vmem:[%s2468_s4 + $0x110] sm:$0xf]  ;;  %v185_v6 = vld [vmem:[%s2468_s4 + $0x114] sm:$0xf] }
  0x2e   :  { %v183_v5 = vld [vmem:[%s2468_s4 + $0x130] sm:$0xf]  ;;  %182 = vst [vmem:[#allocation2 + $0x120] sm:$0xf] %v181_v4  ;;  %186 = vst [vmem:[#allocation2 + $0x128] sm:$0xf] %v185_v6 }
  0x2f   :  { %184 = vst [vmem:[#allocation2 + $0x124] sm:$0xf] %v183_v5  ;;  %v187_v7 = vld [vmem:[%s2468_s4 + $0x134] sm:$0xf]  ;;  %v189_v8 = vld [vmem:[%s2468_s4 + $0x118] sm:$0xf] }
  0x30   :  { %v191_v9 = vld [vmem:[%s2468_s4 + $0x138] sm:$0xf]  ;;  %188 = vst [vmem:[#allocation2 + $0x12c] sm:$0xf] %v187_v7  ;;  %190 = vst [vmem:[#allocation2 + $0x130] sm:$0xf] %v189_v8 }
  0x31   :  { %192 = vst [vmem:[#allocation2 + $0x134] sm:$0xf] %v191_v9  ;;  %v193_v10 = vld [vmem:[%s2468_s4 + $0x11c] sm:$0xf]  ;;  %v199_v12 = vld [vmem:[%s2468_s4 + $0x160] sm:$0xf] }
  0x32   :  { %194 = vst [vmem:[#allocation2 + $0x138] sm:$0xf] %v193_v10  ;;  %196 = vst [vmem:[#allocation2 + $0x13c] sm:$0xff] %v195_v11   ;;  %v201_v13 = vld [vmem:[%s2468_s4 + $0x144] sm:$0xf] }
  0x33   :  { %200 = vst [vmem:[#allocation2 + $0x144] sm:$0xf] %v199_v12  ;;  %v203_v14 = vld [vmem:[%s2468_s4 + $0x164] sm:$0xf]  ;;  %v205_v15 = vld [vmem:[%s2468_s4 + $0x148] sm:$0xf] }
  0x34   :  { %202 = vst [vmem:[#allocation2 + $0x148] sm:$0xf] %v201_v13  ;;  %204 = vst [vmem:[#allocation2 + $0x14c] sm:$0xf] %v203_v14  ;;  %v207_v16 = vld [vmem:[%s2468_s4 + $0x168] sm:$0xf] }
  0x35   :  { %206 = vst [vmem:[#allocation2 + $0x150] sm:$0xf] %v205_v15  ;;  %v209_v17 = vld [vmem:[%s2468_s4 + $0x14c] sm:$0xf]  ;;  %208 = vst [vmem:[#allocation2 + $0x154] sm:$0xf] %v207_v16 }
  0x36   :  { %v211_v18 = vld [vmem:[%s2468_s4 + $0x16c] sm:$0xf]  ;;  %210 = vst [vmem:[#allocation2 + $0x158] sm:$0xf] %v209_v17  ;;  %v213_v19 = vld [vmem:[%s2468_s4 + $0x150] sm:$0xf] }
  0x37   :  { %212 = vst [vmem:[#allocation2 + $0x15c] sm:$0xf] %v211_v18  ;;  %v215_v20 = vld [vmem:[%s2468_s4 + $0x170] sm:$0xf]  ;;  %v217_v21 = vld [vmem:[%s2468_s4 + $0x154] sm:$0xf] }
  0x38   :  { %214 = vst [vmem:[#allocation2 + $0x160] sm:$0xf] %v213_v19  ;;  %216 = vst [vmem:[#allocation2 + $0x164] sm:$0xf] %v215_v20  ;;  %v219_v22 = vld [vmem:[%s2468_s4 + $0x174] sm:$0xf] }
  0x39   :  { %218 = vst [vmem:[#allocation2 + $0x168] sm:$0xf] %v217_v21  ;;  %v221_v23 = vld [vmem:[%s2468_s4 + $0x158] sm:$0xf]  ;;  %220 = vst [vmem:[#allocation2 + $0x16c] sm:$0xf] %v219_v22 }
  0x3a   :  { %v223_v24 = vld [vmem:[%s2468_s4 + $0x178] sm:$0xf]  ;;  %222 = vst [vmem:[#allocation2 + $0x170] sm:$0xf] %v221_v23  ;;  %v225_v25 = vld [vmem:[%s2468_s4 + $0x15c] sm:$0xf] }
  0x3b   :  { %224 = vst [vmem:[#allocation2 + $0x174] sm:$0xf] %v223_v24  ;;  %v227_v26 = vld [vmem:[%s2468_s4 + $0x17c] sm:$0xf]  ;;  %226 = vst [vmem:[#allocation2 + $0x178] sm:$0xf] %v225_v25 }
  0x3c   :  { %228 = vst [vmem:[#allocation2 + $0x17c] sm:$0xf] %v227_v26 }
  0x3d   :  { %451 = vsyncadd [#allocation3], 6144  ;;  %v456_v27 = vld [vmem:[%s2465_s1] sm:$0xff]  ;;  %v457_v28 = vld [vmem:[%s2465_s1 + $0x8] sm:$0xff]  ;;  %vm464_vm0 = vcmask 195584   ;;  %v570_v57 = vlaneseq  ;;  %s1890_s20 = smov 96  }
  0x3e   :  { %v1744_v29 = vpack.c.bf16 %v457_v28, %v456_v27  ;;  %v452_v30 = vld [vmem:[%s2464_s0] sm:$0xff]  ;;  %v458_v31 = vld [vmem:[%s2465_s1 + $0x10] sm:$0xff]  ;;  %v453_v32 = vld [vmem:[%s2464_s0 + $0x8] sm:$0xff]  ;;  %s1892_s21 = smov 64   ;;  %vm643_vm4 = vcmask 261120   ;;  %vm648_vm5 = vcmask 523264  }
  0x3f   :  { %1662 = vmatprep.mubr.msk.f32.mxu0 %vm464_vm0, %v452_v30  ;;  %v454_v33 = vld [vmem:[%s2464_s0 + $0x10] sm:$0xff]  ;;  %v455_v34 = vld [vmem:[%s2464_s0 + $0x18] sm:$0xff]  ;;  %v659_v36 = vld [vmem:[%s2465_s1 + $0x20] sm:$0xff]  ;;  %v2269_v3 = vshrl.u32 %v570_v57, 7  ;;  %s1891_s0 = smov 32   ;;  %vm653_vm6 = vcmask 785408  }
  0x40   :  { %1745 = vmatprep.subr.bf16.mxu0 %v1744_v29  ;;  %v658_v35 = vld [vmem:[%s2465_s1 + $0x18] sm:$0xff]  ;;  %v660_v37 = vld [vmem:[%s2465_s1 + $0x28] sm:$0xff]  ;;  %v661_v39 = vld [vmem:[%s2465_s1 + $0x30] sm:$0xff] }
  0x41   :  { %1747 = vmatpush3.bf16.msra.mxu0 %v1744_v29  ;;  %v1748_v38 = vpack.c.bf16 %v659_v36, %v658_v35  ;;  %v1752_v40 = vpack.c.bf16 %v661_v39, %v660_v37  ;;  %v662_v41 = vld [vmem:[%s2465_s1 + $0x38] sm:$0xff]  ;;  %v663_v42 = vld [vmem:[%s2465_s1 + $0x40] sm:$0xff]  ;;  %v664_v44 = vld [vmem:[%s2465_s1 + $0x48] sm:$0xff]  ;;  %vm590_vm1 = vcmp.lt.s32.totalorder %v2269_v3, 5  ;;  %vm572_vm2 = vcmp.lt.s32.totalorder %v2269_v3, 7 }
  0x42   :  { %1660 = vmatprep.subr.mxu0 %v458_v31  ;;  %v1756_v43 = vpack.c.bf16 %v663_v42, %v662_v41  ;;  %v665_v45 = vld [vmem:[%s2465_s1 + $0x50] sm:$0xff]  ;;  %v666_v47 = vld [vmem:[%s2465_s1 + $0x58] sm:$0xff]  ;;  %v667_v48 = vld [vmem:[%s2465_s1 + $0x60] sm:$0xff]  ;;  %vm581_vm3 = vcmp.lt.s32.totalorder %v2269_v3, 6 }
  0x43   :  { %1749 = vmatprep.subr.bf16.mxu1 %v1748_v38  ;;  %v1760_v46 = vpack.c.bf16 %v665_v45, %v664_v44  ;;  %v1764_v49 = vpack.c.bf16 %v667_v48, %v666_v47  ;;  %v668_v50 = vld [vmem:[%s2465_s1 + $0x68] sm:$0xff]  ;;  %v669_v51 = vld [vmem:[%s2465_s1 + $0x70] sm:$0xff]  ;;  %v1594_v53 = vld [vmem:[%s2466_s2] ss:$0 sm:$0xff] }
  0x44   :  { %1751 = vmatpush3.bf16.msra.mxu1 %v1748_v38  ;;  %v1768_v52 = vpack.c.bf16 %v669_v51, %v668_v50  ;;  %v670_v59 = vld [vmem:[%s2465_s1 + $0x78] sm:$0xff]  ;;  %v671_v60 = vld [vmem:[%s2465_s1 + $0x80] sm:$0xff]  ;;  %v672_v5 = vld [vmem:[%s2465_s1 + $0x88] sm:$0xff] }
  0x45   :  { %1661 = vmatpush3.msra.mxu0 %v458_v31  ;;  %1753 = vmatprep.subr.bf16.mxu1 %v1752_v40  ;;  %v1772_v62 = vpack.c.bf16 %v671_v60, %v670_v59  ;;  %v673_v6 = vld [vmem:[%s2465_s1 + $0x90] sm:$0xff] }
  0x46   :  { %1663 = vmatmul.mubr.msk.f32.vlgmr.msra.gmra.mrb[0].mxu0 %vm464_vm0, %v453_v32  ;;  %v1776_v9 = vpack.c.bf16 %v673_v6, %v672_v5 }
  0x47   :  { %1665 = vmatprep.mubr.msk.f32.mxu0 %vm464_vm0, %v454_v33 }
  0x48   :  { %1755 = vmatpush3.bf16.msra.mxu1 %v1752_v40 }
  0x49   :  { %1757 = vmatprep.subr.bf16.mxu1 %v1756_v43 }
  0x4a   :  { %1666 = vmatmul.mubr.msk.f32.gmra.mrb[2].mxu0 %vm464_vm0, %v455_v34 }
  0x4c   :  { %1759 = vmatpush3.bf16.msra.mxu1 %v1756_v43 }
  0x4d   :  { %1761 = vmatprep.subr.bf16.mxu1 %v1760_v46 }
  0x50   :  { %1763 = vmatpush3.bf16.msra.mxu1 %v1760_v46 }
  0x51   :  { %1765 = vmatprep.subr.bf16.mxu1 %v1764_v49 }
  0x54   :  { %1767 = vmatpush3.bf16.msra.mxu1 %v1764_v49 }
  0x55   :  { %1769 = vmatprep.subr.bf16.mxu1 %v1768_v52 }
  0x58   :  { %1771 = vmatpush3.bf16.msra.mxu1 %v1768_v52 }
  0x59   :  { %1773 = vmatprep.subr.bf16.mxu1 %v1772_v62 }
  0x5c   :  { %1775 = vmatpush3.bf16.msra.mxu1 %v1772_v62 }
  0x5d   :  { %1777 = vmatprep.subr.bf16.mxu1 %v1776_v9 }
  0x60   :  { %1779 = vmatpush3.bf16.msra.mxu1 %v1776_v9  ;;  %v797_v9 = vld [vmem:[%s2465_s1 + $0xa0] sm:$0xff] }
 0x119   :  { %v1664_v54 = vpop.f32.mrb[0].mxu0 }
 0x11a   :  { %v549_v55 = vadd.f32 %v1664_v54, %v1594_v53  ;;  %v543_v56 = vpop.f32.mrb[1].mxu0 }
 0x11b   :  { %v544_v58 = vadd.f32 %v1594_v53, %v543_v56 }
 0x11c   :  { %v2265_v61 = vmax.f32 %v549_v55, 0.0 }
 0x11d   :  { %v2267_v63 = vmax.f32 %v544_v58, 0.0  ;;  %v1667_v0 = vpop.f32.mrb[2].mxu0 }
 0x11e   :  { %v559_v1 = vadd.f32 %v1667_v0, %v1594_v53  ;;  %v553_v2 = vpop.f32.mrb[3].mxu0  ;;  %v587_v8 = vrot.slane %v2265_v61, 3  ;;  %v567_v13 = vrot.slane %v2265_v61, 1  ;;  %v578_v18 = vrot.slane %v2265_v61, 2 }
 0x11f   :  { %v554_v4 = vadd.f32 %v1594_v53, %v553_v2  ;;  %v586_v11 = vrot.slane %v2267_v63, 3  ;;  %v566_v12 = vrot.slane %v2267_v63, 1  ;;  %v577_v19 = vrot.slane %v2267_v63, 2 }
 0x120   :  { %v2277_v7 = vmax.f32 %v559_v1, 0.0 }
 0x121   :  { %v2280_v10 = vmax.f32 %v554_v4, 0.0  ;;  %v593_v21 = vsel %vm590_vm1, %v586_v11, %v587_v8  ;;  %v575_v23 = vsel %vm572_vm2, %v566_v12, %v567_v13  ;;  %v584_v31 = vsel %vm581_vm3, %v577_v19, %v578_v18 }
 0x122   :  { %v569_v14 = vrot.slane %v2277_v7, 1  ;;  %v580_v24 = vrot.slane %v2277_v7, 2  ;;  %v589_v27 = vrot.slane %v2277_v7, 3 }
 0x123   :  { %v579_v15 = vrot.slane %v2280_v10, 2  ;;  %v588_v16 = vrot.slane %v2280_v10, 3  ;;  %v568_v17 = vrot.slane %v2280_v10, 1 }
 0x124   :  { %v576_v29 = vsel %vm572_vm2, %v569_v14, %v566_v12  ;;  %v594_v35 = vsel %vm590_vm1, %v589_v27, %v586_v11  ;;  %v585_v37 = vsel %vm581_vm3, %v580_v24, %v577_v19  ;;  %v799_v11 = vld [vmem:[%s2465_s1 + $0xb0] sm:$0xff]  ;;  %v804_v19 = vld [vmem:[%s2465_s1 + $0xd8] sm:$0xff] }
 0x125   :  { %v592_v20 = vsel %vm590_vm1, %v587_v8, %v588_v16  ;;  %v574_v22 = vsel %vm572_vm2, %v567_v13, %v568_v17  ;;  %v573_v28 = vsel %vm572_vm2, %v568_v17, %v569_v14  ;;  %v583_v30 = vsel %vm581_vm3, %v578_v18, %v579_v15  ;;  %v796_v8 = vld [vmem:[%s2465_s1 + $0x98] sm:$0xff]  ;;  %v801_v14 = vld [vmem:[%s2465_s1 + $0xc0] sm:$0xff]  ;;  %v803_v17 = vld [vmem:[%s2465_s1 + $0xd0] sm:$0xff] }
 0x126   :  { %v1834_v25 = vpack.i.bf16 %v592_v20, %v593_v21  ;;  %v1824_v26 = vpack.i.bf16 %v574_v22, %v575_v23  ;;  %v1839_v32 = vpack.i.bf16 %v576_v29, %v573_v28  ;;  %v1829_v33 = vpack.i.bf16 %v583_v30, %v584_v31  ;;  %v800_v13 = vld [vmem:[%s2465_s1 + $0xb8] sm:$0xff]  ;;  %v805_v20 = vld [vmem:[%s2465_s1 + $0xe0] sm:$0xff]  ;;  %v806_v22 = vld [vmem:[%s2465_s1 + $0xe8] sm:$0xff] }
 0x127   :  { %v591_v34 = vsel %vm590_vm1, %v588_v16, %v589_v27  ;;  %v582_v36 = vsel %vm581_vm3, %v579_v15, %v580_v24  ;;  %v1788_v15 = vpack.c.bf16 %v801_v14, %v800_v13  ;;  %v802_v16 = vld [vmem:[%s2465_s1 + $0xc8] sm:$0xff]  ;;  %v1796_v21 = vpack.c.bf16 %v805_v20, %v804_v19  ;;  %v807_v23 = vld [vmem:[%s2465_s1 + $0xf0] sm:$0xff]  ;;  %v1599_v28 = vld [vmem:[%s2466_s2 + $0x1] ss:$0 sm:$0xff] }
 0x128   :  { %1835 = vrot.lane.b32.xlu1 %v1834_v25, %s1890_s20  ;;  %1825 = vrot.lane.b32.xlu0 %v1824_v26, %s1891_s0  ;;  %v1849_v38 = vpack.i.bf16 %v594_v35, %v591_v34  ;;  %v1844_v39 = vpack.i.bf16 %v585_v37, %v582_v36  ;;  %v1792_v18 = vpack.c.bf16 %v803_v17, %v802_v16  ;;  %v808_v25 = vld [vmem:[%s2465_s1 + $0xf8] sm:$0xff]  ;;  %v809_v26 = vld [vmem:[%s2465_s1 + $0x100] sm:$0xff] }
 0x129   :  { %v1800_v24 = vpack.c.bf16 %v807_v23, %v806_v22  ;;  %v1804_v27 = vpack.c.bf16 %v809_v26, %v808_v25 }
 0x12c   :  { %1840 = vrot.lane.b32.xlu1 %v1839_v32, %s1891_s0  ;;  %1830 = vrot.lane.b32.xlu0 %v1829_v33, %s1892_s21  ;;  %v810_v32 = vld [vmem:[%s2465_s1 + $0x108] sm:$0xff]  ;;  %v811_v33 = vld [vmem:[%s2465_s1 + $0x110] sm:$0xff] }
 0x12d   :  { %v1808_v35 = vpack.c.bf16 %v811_v33, %v810_v32 }
 0x130   :  { %1850 = vrot.lane.b32.xlu1 %v1849_v38, %s1890_s20  ;;  %1845 = vrot.lane.b32.xlu0 %v1844_v39, %s1892_s21 }
 0x19a   :  { %v1836_v40 = vpop.permute.xlu1 %1835  ;;  %v1826_v41 = vpop.permute.xlu0 %1825 }
 0x19b   :  { %v1828_v42 = vunpack.i.h.bf16 %v1826_v41  ;;  %v1827_v43 = vunpack.i.l.bf16 %v1826_v41  ;;  %v1838_v46 = vunpack.i.h.bf16 %v1836_v40  ;;  %v1837_v47 = vunpack.i.l.bf16 %v1836_v40 }
 0x19d   :  { %v644_v52 = vsel %vm643_vm4, %v2267_v63, %v1827_v43  ;;  %v645_v53 = vsel %vm643_vm4, %v2265_v61, %v1828_v42 }
 0x19e   :  { %v1841_v44 = vpop.permute.xlu1 %1840  ;;  %v1831_v45 = vpop.permute.xlu0 %1830 }
 0x19f   :  { %v1833_v48 = vunpack.i.h.bf16 %v1831_v45  ;;  %v1832_v49 = vunpack.i.l.bf16 %v1831_v45  ;;  %v1843_v50 = vunpack.i.h.bf16 %v1841_v44  ;;  %v1842_v51 = vunpack.i.l.bf16 %v1841_v44 }
 0x1a1   :  { %v649_v54 = vsel %vm648_vm5, %v644_v52, %v1832_v49  ;;  %v650_v55 = vsel %vm648_vm5, %v645_v53, %v1833_v48  ;;  %v646_v63 = vsel %vm643_vm4, %v2280_v10, %v1842_v51  ;;  %v647_v61 = vsel %vm643_vm4, %v2277_v7, %v1843_v50  ;;  %v798_v7 = vld [vmem:[%s2465_s1 + $0xa8] sm:$0xff] }
 0x1a2   :  { %v1851_v56 = vpop.permute.xlu1 %1850  ;;  %v1846_v57 = vpop.permute.xlu0 %1845  ;;  %v654_v58 = vsel %vm653_vm6, %v649_v54, %v1837_v47  ;;  %v655_v59 = vsel %vm653_vm6, %v650_v55, %v1838_v46  ;;  %v1780_v10 = vpack.c.bf16 %v797_v9, %v796_v8  ;;  %v1784_v12 = vpack.c.bf16 %v799_v11, %v798_v7 }
 0x1a3   :  { %v1853_v60 = vunpack.i.h.bf16 %v1851_v56  ;;  %v1852_v62 = vunpack.i.l.bf16 %v1851_v56  ;;  %v1848_v0 = vunpack.i.h.bf16 %v1846_v57  ;;  %v1847_v1 = vunpack.i.l.bf16 %v1846_v57  ;;  %1700 = vmatprep.mubr.f32.mxu1 %v654_v58 }
 0x1a4   :  { %1701 = vmatmul.mubr.f32.vlgmr.msra.gmra.mrb[0].mxu1 %v655_v59  ;;  %1781 = vmatprep.subr.bf16.mxu0 %v1780_v10 }
 0x1a5   :  { %v651_v2 = vsel %vm648_vm5, %v646_v63, %v1847_v1  ;;  %v652_v4 = vsel %vm648_vm5, %v647_v61, %v1848_v0  ;;  %1783 = vmatpush3.bf16.msra.mxu0 %v1780_v10  ;;  %v1600_v63 = vld [vmem:[%s2466_s2 + $0x2] ss:$0 sm:$0xff]  ;;  %v913_v61 = vand.u32 15, %v2269_v3  ;;  %v1893_v10 = vmov -inf  }
 0x1a6   :  { %v656_v5 = vsel %vm653_vm6, %v651_v2, %v1852_v62  ;;  %v657_v6 = vsel %vm653_vm6, %v652_v4, %v1853_v60  ;;  %1785 = vmatprep.subr.bf16.mxu0 %v1784_v12  ;;  %v907_v2 = vadd.s32 16, %v2269_v3  ;;  %v966_v11 = vsel %vm653_vm6, 0.0, %v1893_v10 }
 0x1a7   :  { %1703 = vmatprep.mubr.f32.mxu1 %v656_v5  ;;  %vm957_vm7 = vcmp.lt.s32.totalorder %v913_v61, 7 }
 0x1a8   :  { %1704 = vmatmul.mubr.f32.gmra.mrb[2].mxu1 %v657_v6  ;;  %v927_v8 = vand.u32 15, %v907_v2 }
 0x1a9   :  { %1787 = vmatpush3.bf16.msra.mxu0 %v1784_v12 }
 0x1aa   :  { %1789 = vmatprep.subr.bf16.mxu0 %v1788_v15  ;;  %vm959_vm8 = vcmp.lt.s32.totalorder %v927_v8, 7 }
 0x1ad   :  { %1791 = vmatpush3.bf16.msra.mxu0 %v1788_v15 }
 0x1ae   :  { %1793 = vmatprep.subr.bf16.mxu0 %v1792_v18 }
 0x1b1   :  { %1795 = vmatpush3.bf16.msra.mxu0 %v1792_v18 }
 0x1b2   :  { %1797 = vmatprep.subr.bf16.mxu0 %v1796_v21 }
 0x1b5   :  { %1799 = vmatpush3.bf16.msra.mxu0 %v1796_v21 }
 0x1b6   :  { %1801 = vmatprep.subr.bf16.mxu0 %v1800_v24 }
 0x1b9   :  { %1803 = vmatpush3.bf16.msra.mxu0 %v1800_v24 }
 0x1ba   :  { %1805 = vmatprep.subr.bf16.mxu0 %v1804_v27 }
 0x1bd   :  { %1807 = vmatpush3.bf16.msra.mxu0 %v1804_v27 }
 0x1be   :  { %1809 = vmatprep.subr.bf16.mxu0 %v1808_v35 }
 0x1c1   :  { %1811 = vmatpush3.bf16.msra.mxu0 %v1808_v35 }
 0x277   :  { %v1702_v29 = vpop.f32.mrb[0].mxu1 }
 0x278   :  { %v751_v30 = vadd.f32 %v1702_v29, %v1599_v28  ;;  %v745_v31 = vpop.f32.mrb[1].mxu1 }
 0x279   :  { %v746_v34 = vadd.f32 %v1599_v28, %v745_v31 }
 0x27a   :  { %v765_v36 = vmax.f32 %v751_v30, 0.0 }
 0x27b   :  { %v764_v37 = vmax.f32 %v746_v34, 0.0  ;;  %v1705_v38 = vpop.f32.mrb[2].mxu1 }
 0x27c   :  { %v761_v39 = vadd.f32 %v1705_v38, %v1599_v28  ;;  %v755_v40 = vpop.f32.mrb[3].mxu1  ;;  %v769_v43 = vrot.slane %v765_v36, 1 }
 0x27d   :  { %v756_v41 = vadd.f32 %v1599_v28, %v755_v40  ;;  %v768_v44 = vrot.slane %v764_v37, 1 }
 0x27e   :  { %v767_v42 = vmax.f32 %v761_v39, 0.0 }
 0x27f   :  { %v766_v45 = vmax.f32 %v756_v41, 0.0  ;;  %v774_v51 = vsel %vm572_vm2, %v768_v44, %v769_v43 }
 0x280   :  { %v771_v46 = vrot.slane %v767_v42, 1 }
 0x281   :  { %v770_v47 = vrot.slane %v766_v45, 1 }
 0x282   :  { %v775_v48 = vsel %vm572_vm2, %v771_v46, %v768_v44 }
 0x283   :  { %v772_v49 = vsel %vm572_vm2, %v770_v47, %v771_v46  ;;  %v773_v50 = vsel %vm572_vm2, %v769_v43, %v770_v47 }
 0x284   :  { %v1859_v52 = vpack.i.bf16 %v775_v48, %v772_v49  ;;  %v1854_v53 = vpack.i.bf16 %v773_v50, %v774_v51 }
 0x286   :  { %1860 = vrot.lane.b32.xlu1 %v1859_v52, %s1892_s21  ;;  %1855 = vrot.lane.b32.xlu0 %v1854_v53, %s1892_s21 }
 0x2f8   :  { %v1861_v54 = vpop.permute.xlu1 %1860  ;;  %v1856_v55 = vpop.permute.xlu0 %1855 }
 0x2f9   :  { %v1862_v56 = vunpack.i.l.bf16 %v1861_v54  ;;  %v1858_v57 = vunpack.i.h.bf16 %v1856_v55  ;;  %v1857_v58 = vunpack.i.l.bf16 %v1856_v55  ;;  %v1863_v62 = vunpack.i.h.bf16 %v1861_v54 }
 0x2fb   :  { %v793_v59 = vsel %vm648_vm5, %v765_v36, %v1858_v57  ;;  %v792_v60 = vsel %vm648_vm5, %v764_v37, %v1857_v58  ;;  %v794_v0 = vsel %vm648_vm5, %v766_v45, %v1862_v56  ;;  %v795_v1 = vsel %vm648_vm5, %v767_v42, %v1863_v62 }
 0x2fc   :  { %1738 = vmatprep.mubr.f32.mxu0 %v792_v60 }
 0x2fd   :  { %1739 = vmatmul.mubr.f32.vlgmr.msra.gmra.mrb[4].mxu0 %v793_v59 }
 0x2fe   :  { %1741 = vmatprep.mubr.f32.mxu0 %v794_v0 }
 0x301   :  { %1742 = vmatmul.mubr.f32.gmra.mrb[6].mxu0 %v795_v1 }
 0x3d0   :  { %v1740_v4 = vpop.f32.mrb[4].mxu0 }
 0x3d1   :  { %v883_v5 = vpop.f32.mrb[5].mxu0 }
 0x3d2   :  { %v884_v6 = vadd.f32 %v1600_v63, %v883_v5 }
 0x3d4   :  { %v902_v9 = vmax.f32 %v884_v6, 0.0  ;;  %v1743_v7 = vpop.f32.mrb[6].mxu0 }
 0x3d5   :  { %v893_v12 = vpop.f32.mrb[7].mxu0 }
 0x3d6   :  { %v961_v13 = vsel %vm957_vm7, %v902_v9, 0.0  ;;  %v894_v14 = vadd.f32 %v1600_v63, %v893_v12 }
 0x3d7   :  { %v965_v15 = vsel %vm653_vm6, %v961_v13, -inf }
 0x3d8   :  { %v967_v16 = vmax.f32 %v965_v15, %v966_v11  ;;  %v904_v17 = vmax.f32 %v894_v14, 0.0 }
 0x3da   :  { %v968_v18 = vrot.slane %v967_v16, 4  ;;  %v963_v19 = vsel %vm959_vm8, %v904_v17, 0.0 }
 0x3db   :  { %v974_v20 = vsel %vm653_vm6, %v963_v19, -inf }
 0x3dc   :  { %v969_v21 = vmax.f32 %v967_v16, %v968_v18  ;;  %v976_v22 = vmax.f32 %v974_v20, %v966_v11 }
 0x3de   :  { %v970_v23 = vrot.slane %v969_v21, 2  ;;  %v977_v24 = vrot.slane %v976_v22, 4 }
 0x3e0   :  { %v971_v25 = vmax.f32 %v969_v21, %v970_v23  ;;  %v978_v26 = vmax.f32 %v976_v22, %v977_v24 }
 0x3e2   :  { %v972_v27 = vrot.slane %v971_v25, 1  ;;  %v979_v28 = vrot.slane %v978_v26, 2 }
 0x3e4   :  { %v973_v29 = vmax.f32 %v971_v25, %v972_v27  ;;  %v980_v30 = vmax.f32 %v978_v26, %v979_v28 }
 0x3e6   :  { %v981_v31 = vrot.slane %v980_v30, 1 }
 0x3e8   :  { %v982_v32 = vmax.f32 %v980_v30, %v981_v31 }
 0x3e9   :  { %1886 = dma.done.wait [#allocation3], 6144 }
 0x3ea   :  { %1887 = vsyncadd [#allocation3], 4294961152  ;;  %v1894_v33 = vmov 0   ;;  %v990_v34 = vld [vmem:[#allocation2 + $0x8] sm:$0xff]  ;;  %v989_v35 = vld [vmem:[#allocation2] sm:$0xff]  ;;  %v987_v48 = vpack.c.bf16 %v973_v29, %v973_v29  ;;  %v988_v49 = vpack.c.bf16 %v982_v32, %v982_v32  ;;  %vm1086_vm9 = vcmask 1041409  }
 0x3eb   :  { %1124 = vmatprep.mubr.bf16.mxu1 %v1894_v33  ;;  %1165 = vmatprep.mubr.bf16.mxu0 %v1894_v33  ;;  %v998_v36 = vld [vmem:[#allocation2 + $0x48] sm:$0xff]  ;;  %v992_v37 = vld [vmem:[#allocation2 + $0x18] sm:$0xff]  ;;  %v991_v38 = vld [vmem:[#allocation2 + $0x10] sm:$0xff]  ;;  %s1895_s26 = smov [#allocation4]   ;;  %vm1558_vm10 = vcmask 41984  }
 0x3ec   :  { %1092 = vmatprep.subr.bf16.mxu1 %v990_v34  ;;  %1133 = vmatprep.subr.bf16.mxu0 %v992_v37  ;;  %v1000_v39 = vld [vmem:[#allocation2 + $0x58] sm:$0xff]  ;;  %v997_v40 = vld [vmem:[#allocation2 + $0x40] sm:$0xff]  ;;  %v1006_v41 = vld [vmem:[#allocation2 + $0x88] sm:$0xff]  ;;  %v1084_v54 = vunpack.c.l.b16 %v987_v48  ;;  %v1085_v55 = vunpack.c.l.b16 %v988_v49  ;;  %v1048_v34 = vsub.s32 1, %v2269_v3  ;;  %s1566_s27 = sshll.u32 %s1895_s26, 4  ;;  %s1567_s27 = int_to_ptr.vmem [resolvable:$true] %s1566_s27 }
 0x3ed   :  { %1093 = vmatpush1.bf16.msra.mxu1 %v989_v35  ;;  %1134 = vmatpush1.bf16.msra.mxu0 %v991_v38  ;;  %v999_v42 = vld [vmem:[#allocation2 + $0x50] sm:$0xff]  ;;  %v1008_v43 = vld [vmem:[#allocation2 + $0x98] sm:$0xff]  ;;  %v1005_v44 = vld [vmem:[#allocation2 + $0x80] sm:$0xff]  ;;  %v1052_v35 = vsub.s32 2, %v2269_v3  ;;  %p1869_p1 = scmp.lt.s32.totalorder %s1567_s27, %s1567_s27 }
 0x3ee   :  { %1094 = vmatprep.subr.bf16.mxu1 %v998_v36  ;;  %1135 = vmatprep.subr.bf16.mxu0 %v1000_v39  ;;  %v1014_v45 = vld [vmem:[#allocation2 + $0xc8] sm:$0xff]  ;;  %v1007_v46 = vld [vmem:[#allocation2 + $0x90] sm:$0xff]  ;;  %v1016_v47 = vld [vmem:[#allocation2 + $0xd8] sm:$0xff]  ;;  %v1087_v60 = vsel %vm1086_vm9, %v1085_v55, %v1084_v54  ;;  %v1056_v36 = vsub.s32 3, %v2269_v3 }
 0x3ef   :  { %v1013_v50 = vld [vmem:[#allocation2 + $0xc0] sm:$0xff]  ;;  %v1022_v51 = vld [vmem:[#allocation2 + $0x108] sm:$0xff]  ;;  %v1015_v52 = vld [vmem:[#allocation2 + $0xd0] sm:$0xff]  ;;  %v1088_v63 = vpack.c.b16 %v1087_v60, %v1087_v60  ;;  %v1064_v60 = vsub.s32 5, %v2269_v3 }
 0x3f0   :  { %v1024_v53 = vld [vmem:[#allocation2 + $0x118] sm:$0xff]  ;;  %v1021_v56 = vld [vmem:[#allocation2 + $0x100] sm:$0xff]  ;;  %v1030_v57 = vld [vmem:[#allocation2 + $0x148] sm:$0xff] }
 0x3f1   :  { %1095 = vmatpush1.bf16.msra.mxu1 %v997_v40  ;;  %1136 = vmatpush1.bf16.msra.mxu0 %v999_v42  ;;  %v1023_v58 = vld [vmem:[#allocation2 + $0x110] sm:$0xff]  ;;  %v1032_v59 = vld [vmem:[#allocation2 + $0x158] sm:$0xff]  ;;  %v1029_v62 = vld [vmem:[#allocation2 + $0x140] sm:$0xff] }
 0x3f2   :  { %1096 = vmatprep.subr.bf16.mxu1 %v1006_v41  ;;  %1137 = vmatprep.subr.bf16.mxu0 %v1008_v43  ;;  %v994_v0 = vld [vmem:[#allocation2 + $0x28] sm:$0xff]  ;;  %v1031_v1 = vld [vmem:[#allocation2 + $0x150] sm:$0xff]  ;;  %v996_v61 = vld [vmem:[#allocation2 + $0x38] sm:$0xff] }
 0x3f3   :  { %v993_v2 = vld [vmem:[#allocation2 + $0x20] sm:$0xff]  ;;  %v1002_v4 = vld [vmem:[#allocation2 + $0x68] sm:$0xff]  ;;  %v995_v5 = vld [vmem:[#allocation2 + $0x30] sm:$0xff] }
 0x3f4   :  { %v1004_v6 = vld [vmem:[#allocation2 + $0x78] sm:$0xff]  ;;  %v1001_v8 = vld [vmem:[#allocation2 + $0x60] sm:$0xff]  ;;  %v1010_v9 = vld [vmem:[#allocation2 + $0xa8] sm:$0xff] }
 0x3f5   :  { %1097 = vmatpush1.bf16.msra.mxu1 %v1005_v44  ;;  %1138 = vmatpush1.bf16.msra.mxu0 %v1007_v46  ;;  %v1003_v7 = vld [vmem:[#allocation2 + $0x70] sm:$0xff]  ;;  %v1012_v10 = vld [vmem:[#allocation2 + $0xb8] sm:$0xff]  ;;  %v1009_v11 = vld [vmem:[#allocation2 + $0xa0] sm:$0xff] }
 0x3f6   :  { %1098 = vmatprep.subr.bf16.mxu1 %v1014_v45  ;;  %1139 = vmatprep.subr.bf16.mxu0 %v1016_v47  ;;  %v1018_v12 = vld [vmem:[#allocation2 + $0xe8] sm:$0xff]  ;;  %v1011_v13 = vld [vmem:[#allocation2 + $0xb0] sm:$0xff]  ;;  %v1020_v14 = vld [vmem:[#allocation2 + $0xf8] sm:$0xff] }
 0x3f7   :  { %v1017_v15 = vld [vmem:[#allocation2 + $0xe0] sm:$0xff]  ;;  %v1026_v16 = vld [vmem:[#allocation2 + $0x128] sm:$0xff]  ;;  %v1019_v17 = vld [vmem:[#allocation2 + $0xf0] sm:$0xff] }
 0x3f8   :  { %v1028_v18 = vld [vmem:[#allocation2 + $0x138] sm:$0xff]  ;;  %v1025_v19 = vld [vmem:[#allocation2 + $0x120] sm:$0xff]  ;;  %v1034_v20 = vld [vmem:[#allocation2 + $0x168] sm:$0xff] }
 0x3f9   :  { %1099 = vmatpush1.bf16.msra.mxu1 %v1013_v50  ;;  %1140 = vmatpush1.bf16.msra.mxu0 %v1015_v52  ;;  %v1027_v21 = vld [vmem:[#allocation2 + $0x130] sm:$0xff]  ;;  %v1036_v22 = vld [vmem:[#allocation2 + $0x178] sm:$0xff]  ;;  %v1033_v23 = vld [vmem:[#allocation2 + $0x160] sm:$0xff] }
 0x3fa   :  { %1100 = vmatprep.subr.bf16.mxu1 %v1022_v51  ;;  %1141 = vmatprep.subr.bf16.mxu0 %v1024_v53  ;;  %v1035_v24 = vld [vmem:[#allocation2 + $0x170] sm:$0xff]  ;;  %v1265_v25 = vld [vmem:[%s2467_s3 + $0x8] sm:$0x3f]  ;;  %v1264_v26 = vld [vmem:[%s2467_s3] sm:$0x3f] }
 0x3fb   :  { %v1267_v27 = vld [vmem:[%s2467_s3 + $0x18] sm:$0x3f]  ;;  %v1266_v28 = vld [vmem:[%s2467_s3 + $0x10] sm:$0x3f]  ;;  %v1269_v29 = vld [vmem:[%s2467_s3 + $0x28] sm:$0x3f] }
 0x3fc   :  { %v1601_v30 = vld [vmem:[%s2467_s3 + $0x6] ss:$8 sm:$0xf] }
 0x3fd   :  { %1101 = vmatpush1.bf16.msra.mxu1 %v1021_v56  ;;  %1142 = vmatpush1.bf16.msra.mxu0 %v1023_v58  ;;  %v1602_v31 = vld [vmem:[%s2467_s3 + $0x6] ss:$8 sm:$0xf0]  ;;  %v1271_v58 = vld [vmem:[%s2467_s3 + $0x38] sm:$0x3f] }
 0x3fe   :  { %1102 = vmatprep.subr.bf16.mxu1 %v1030_v57  ;;  %1143 = vmatprep.subr.bf16.mxu0 %v1032_v59  ;;  %v1040_v32 = vor.u32 %v1602_v31, %v1601_v30  ;;  %v1268_v57 = vld [vmem:[%s2467_s3 + $0x20] sm:$0x3f]  ;;  %v1060_v59 = vsub.s32 4, %v2269_v3 }
 0x400   :  { %v1049_v38 = vrot.slane %v1040_v32, %v1048_v34  ;;  %v1053_v39 = vrot.slane %v1040_v32, %v1052_v35  ;;  %v1057_v40 = vrot.slane %v1040_v32, %v1056_v36 }
 0x401   :  { %1103 = vmatpush1.bf16.msra.mxu1 %v1029_v62  ;;  %1144 = vmatpush1.bf16.msra.mxu0 %v1031_v1  ;;  %v1072_v62 = vsub.s32 7, %v2269_v3  ;;  %v1065_v1 = vrot.slane %v1040_v32, %v1064_v60 }
 0x402   :  { %1174 = vmatprep.subr.bf16.mxu1 %v994_v0  ;;  %1215 = vmatprep.subr.bf16.mxu0 %v996_v61  ;;  %v1061_v0 = vrot.slane %v1040_v32, %v1060_v59 }
 0x404   :  { %1603 = vmatmul.mubr.msk.bf16.vlgmr.msra.gmra.mrb[4].mxu1 %vm653_vm6, %v1088_v63  ;;  %1604 = vmatmul.mubr.msk.bf16.vlgmr.msra.gmra.mrb[8].mxu0 %vm653_vm6, %v1088_v63 }
 0x405   :  { %1175 = vmatpush1.bf16.msra.mxu1 %v993_v2  ;;  %1216 = vmatpush1.bf16.msra.mxu0 %v995_v5  ;;  %v1068_v5 = vsub.s32 6, %v2269_v3 }
 0x406   :  { %1176 = vmatprep.subr.bf16.mxu1 %v1002_v4  ;;  %1217 = vmatprep.subr.bf16.mxu0 %v1004_v6 }
 0x407   :  { %1206 = vmatprep.mubr.bf16.mxu1 %v1894_v33  ;;  %1247 = vmatprep.mubr.bf16.mxu0 %v1894_v33  ;;  %v1044_v33 = vsub.s32 0, %v2269_v3 }
 0x409   :  { %1177 = vmatpush1.bf16.msra.mxu1 %v1001_v8  ;;  %1218 = vmatpush1.bf16.msra.mxu0 %v1003_v7  ;;  %v1045_v37 = vrot.slane %v1040_v32, %v1044_v33 }
 0x40a   :  { %1178 = vmatprep.subr.bf16.mxu1 %v1010_v9  ;;  %1219 = vmatprep.subr.bf16.mxu0 %v1012_v10 }
 0x40d   :  { %1179 = vmatpush1.bf16.msra.mxu1 %v1009_v11  ;;  %1220 = vmatpush1.bf16.msra.mxu0 %v1011_v13 }
 0x40e   :  { %1180 = vmatprep.subr.bf16.mxu1 %v1018_v12  ;;  %1221 = vmatprep.subr.bf16.mxu0 %v1020_v14 }
 0x411   :  { %1181 = vmatpush1.bf16.msra.mxu1 %v1017_v15  ;;  %1222 = vmatpush1.bf16.msra.mxu0 %v1019_v17 }
 0x412   :  { %1182 = vmatprep.subr.bf16.mxu1 %v1026_v16  ;;  %1223 = vmatprep.subr.bf16.mxu0 %v1028_v18  ;;  %v1069_v16 = vrot.slane %v1040_v32, %v1068_v5  ;;  %v1270_v18 = vld [vmem:[%s2467_s3 + $0x30] sm:$0x3f]  ;;  %s1864_s3 = scalar_lea.vmem %s1567_s27, 32 }
 0x413   :  { %p1865_p0 = scmp.ne.s32.totalorder %s1567_s27, %s1864_s3  ;;  %p1870_p2 = scmp.lt.s32.totalorder %s1864_s3, %s1864_s3 }
 0x415   :  { %1183 = vmatpush1.bf16.msra.mxu1 %v1025_v19  ;;  %1224 = vmatpush1.bf16.msra.mxu0 %v1027_v21  ;;  %p1871_p3 = por %p1870_p2, %p1869_p1 }
 0x416   :  { %1184 = vmatprep.subr.bf16.mxu1 %v1034_v20  ;;  %1225 = vmatprep.subr.bf16.mxu0 %v1036_v22  ;;  %v1607_v22 = vld [vmem:[%s2466_s2 + $0x3] ss:$0 sm:$0xff] }
 0x417   :  { %p1872_p4 = pnand %p1871_p3, %p1865_p0 }
 0x419   :  { %1185 = vmatpush1.bf16.msra.mxu1 %v1033_v23  ;;  %1226 = vmatpush1.bf16.msra.mxu0 %v1035_v24 }
 0x41a   :  { %1277 = vmatprep.subr.mxu0 %v1265_v25  ;;  %1347 = vmatprep.subr.mxu1 %v1267_v27 }
 0x41c   :  { %1605 = vmatmul.mubr.msk.bf16.vlgmr.msra.gmra.mrb[8].mxu1 %vm653_vm6, %v1088_v63  ;;  %1606 = vmatmul.mubr.msk.bf16.vlgmr.msra.gmra.mrb[12].mxu0 %vm653_vm6, %v1088_v63  ;;  %v1073_v63 = vrot.slane %v1040_v32, %v1072_v62 }
 0x422   :  { %1278 = vmatpush1.xpose.msra.mxu0 %v1264_v26  ;;  %1348 = vmatpush1.xpose.msra.mxu1 %v1266_v28 }
 0x423   :  { %1417 = vmatprep.subr.mxu1 %v1269_v29 }
 0x4d7   :  { %v1126_v41 = vpop.f32.mrb[4].mxu1  ;;  %v1167_v44 = vpop.f32.mrb[8].mxu0 }
 0x4d8   :  { %v1127_v42 = vadd.f32 %v1126_v41, %v1045_v37  ;;  %v1128_v43 = vpop.f32.mrb[5].mxu1  ;;  %v1168_v47 = vadd.f32 %v1167_v44, %v1053_v39  ;;  %v1169_v48 = vpop.f32.mrb[9].mxu0 }
 0x4d9   :  { %v1129_v45 = vadd.f32 %v1128_v43, %v1049_v38  ;;  %v1130_v46 = vpop.f32.mrb[6].mxu1  ;;  %v1170_v51 = vadd.f32 %v1169_v48, %v1057_v40  ;;  %v1171_v52 = vpop.f32.mrb[10].mxu0 }
 0x4da   :  { %v1256_v49 = vmax.f32 %v1127_v42, 0.0  ;;  %v1131_v50 = vpop.f32.mrb[7].mxu1  ;;  %v1258_v54 = vmax.f32 %v1168_v47, 0.0  ;;  %v1172_v55 = vpop.f32.mrb[11].mxu0 }
 0x4db   :  { %v1257_v53 = vmax.f32 %v1129_v45, 0.0  ;;  %v1259_v56 = vmax.f32 %v1170_v51, 0.0 }
 0x4dd   :  { %1341 = vmatprep.mubr.f32.mxu0 %v1257_v53  ;;  %1411 = vmatprep.mubr.f32.mxu1 %v1259_v56 }
 0x4de   :  { %1342 = vmatmul.mubr.f32.vlgmr.msra.gmra.mrb[16].mxu0 %v1256_v49  ;;  %1412 = vmatmul.mubr.f32.vlgmr.msra.gmra.mrb[12].mxu1 %v1258_v54 }
 0x4df   :  { %1418 = vmatpush1.xpose.msra.mxu1 %v1268_v57 }
 0x4e0   :  { %1487 = vmatprep.subr.mxu1 %v1271_v58 }
 0x4ef   :  { %v1208_v61 = vpop.f32.mrb[8].mxu1  ;;  %v1249_v6 = vpop.f32.mrb[12].mxu0 }
 0x4f0   :  { %v1209_v2 = vadd.f32 %v1208_v61, %v1061_v0  ;;  %v1210_v4 = vpop.f32.mrb[9].mxu1  ;;  %v1251_v7 = vpop.f32.mrb[13].mxu0  ;;  %v1250_v3 = vadd.f32 %v1249_v6, %v1069_v16 }
 0x4f1   :  { %v1211_v8 = vadd.f32 %v1210_v4, %v1065_v1  ;;  %v1212_v9 = vpop.f32.mrb[10].mxu1  ;;  %v1252_v11 = vadd.f32 %v1251_v7, %v1073_v63  ;;  %v1253_v12 = vpop.f32.mrb[14].mxu0 }
 0x4f2   :  { %v1213_v10 = vpop.f32.mrb[11].mxu1  ;;  %v1254_v14 = vpop.f32.mrb[15].mxu0  ;;  %v1260_v15 = vmax.f32 %v1209_v2, 0.0  ;;  %v1262_v19 = vmax.f32 %v1250_v3, 0.0 }
 0x4f3   :  { %v1261_v13 = vmax.f32 %v1211_v8, 0.0  ;;  %v1263_v17 = vmax.f32 %v1252_v11, 0.0 }
 0x4f5   :  { %1481 = vmatprep.mubr.f32.mxu1 %v1261_v13 }
 0x4f6   :  { %1482 = vmatmul.mubr.f32.vlgmr.msra.gmra.mrb[12].mxu1 %v1260_v15 }
 0x4f7   :  { %1488 = vmatpush1.xpose.msra.mxu1 %v1270_v18  ;;  %1551 = vmatprep.mubr.f32.mxu1 %v1263_v17 }
 0x4fe   :  { %1552 = vmatmul.mubr.f32.vlgmr.msra.gmra.mrb[12].mxu1 %v1262_v19 }
 0x5b1   :  { %v1343_v20 = vpop.f32.mrb[16].mxu0 }
 0x5b2   :  { %v1345_v21 = vpop.f32.mrb[17].mxu0  ;;  %v1344_v23 = vadd.f32 %v1607_v22, %v1343_v20 }
 0x5d1   :  { %v1553_v24 = vpop.f32.mrb[12].mxu1 }
 0x5d2   :  { %v1813_v25 = vadd.f32 %v1553_v24, %v1344_v23  ;;  %v1555_v26 = vpop.f32.mrb[13].mxu1 }
 0x5d4   :  { %v1557_v27 = vmax.f32 %v1813_v25, 0.0 }
 0x5d6   :  { %1559 = vst.msk [vmem:[#allocation4] sm:$0x3] %vm1558_vm10, %v1557_v27 }
 0x5d7   :  { %1875 = shalt.err (!%p1872_p4)
}
 0x5d8   :  { %s1876_s2 = scalar_lea.hbm %s2469_s5, 32 }
 0x5d9   :  { %p1877_p5 = scmp.ne.s32.totalorder %s2469_s5, %s1876_s2  ;;  %p1880_p6 = scmp.lt.u32.totalorder %s1876_s2, %s2469_s5 }
 0x5db   :  { %p1882_p7 = pnand %p1880_p6, %p1877_p5 }
 0x5dd   :  { %1885 = shalt.err (!%p1882_p7)
}
 0x5de   :  { %1569 = dma.vmem_to_hbm [thread:$0]  %s1567_s27, 32, %s2469_s5, [#allocation5]  }
 0x5df   :  { %1888 = dma.done.wait [#allocation5], 32  }
 0x5e0   :  { %1889 = vsyncadd [#allocation5], 4294967264 }
 0x5e1   :  { %1573 = vsyncpa [#allocation5], 1 }
 0x5e2   :  { %1574 = vsyncmov [#allocation3] }
 0x5e5   :  { %s1575_s8 = vpop.sfrf %1574 }
 0x5e6   :  { %p1608_p8 = scmp.ne.s32.totalorder %s1575_s8, 0 }
 0x5e8   :  { %1579 = shalt.err (%p1608_p8)  }

</bundles_post_ra>
